<compile_context>
chip_gen: v7x
topology: tpu7x:2x2x1
jax: 0.10.0
libtpu: 0.0.40
codegen_flags: <defaults>
</compile_context>

<pallas_src>
import jax
import jax.numpy as jnp
from jax.experimental import pallas as pl
from jax.experimental.pallas import tpu as pltpu


def _cdiv(a, b):
    return -(-a // b)


def _round_up(x, m):
    return ((x + m - 1) // m) * m


def _encoder_kernel(x_ref, w_ref, b_ref, o_ref):
    # x_ref: (1, C, T)   w_ref: (TD, C)   b_ref: (TD, 1)   o_ref: (1, TD, T)
    x = x_ref[0]                          # (C, T)
    w = w_ref[...]                        # (TD, C)
    b = b_ref[...].astype(jnp.float32)    # (TD, 1)
    C = x.shape[0]
    if C <= 4:
        # Memory-bound regime with a tiny contraction: unrolled VPU
        # broadcast-FMA (threshold kept low so the VALU slot can't become the
        # saturating slot against v7x's ~3.2 TB/s HBM).
        xf = x.astype(jnp.float32)
        wf = w.astype(jnp.float32)
        acc = wf[:, 0:1] * xf[0:1, :]
        for c in range(1, C):
            acc = acc + wf[:, c:c + 1] * xf[c:c + 1, :]
    else:
        # MXU path; accumulate in f32.
        acc = jnp.dot(w, x, preferred_element_type=jnp.float32)
    o_ref[0] = (acc + b).astype(o_ref.dtype)


def _choose_tiles(B, C, D, HW, x_isz, o_isz, w_isz, max_lane_tile):
    # --- D tile -------------------------------------------------------------
    # Keep the whole weight resident when D is modest (single D tile -> x and
    # W are never re-streamed); otherwise tile at 256 (multiple of 8, so the
    # ragged edge block is legal and its writeback is masked).
    t_d = D if D <= 512 else 256
    n_d = _cdiv(D, t_d)

    # --- HW lane tile ---------------------------------------------------------
    # Budget the double-buffered, lane-tile-dependent blocks (out + x) so the
    # total double-buffered VMEM footprint stays around <= 24 MiB (v7x-safe).
    resident = 2 * (t_d * C * w_isz + t_d * w_isz)          # weight + bias, x2 buf
    budget = max((24 << 20) - resident, 4 << 20)
    per_lane = 2 * (t_d * o_isz + C * x_isz)                # out + x bytes per lane, x2 buf
    t_cap = (budget // per_lane) // 128 * 128
    t_cap = max(128, min(int(t_cap), max_lane_tile))
    if HW <= t_cap:
        t = HW          # full dim: always a legal block; no ragged HW tile at all
    else:
        t = t_cap       # multiple of 128; only the last tile is ragged (masked vst)
    n_hw = _cdiv(HW, t)

    # --- megacore -------------------------------------------------------------
    # v7x has 2 TensorCores; make sure there are >= 2 parallel grid steps.
    if B * n_d * n_hw == 1 and HW >= 256:
        t = _round_up((HW + 1) // 2, 128)
        n_hw = _cdiv(HW, t)
    return t_d, n_d, t, n_hw


def default_encoder_linear(x, weight, bias2d, *, max_lane_tile=8192):
    """y[b,d,h,w] = sum_c weight[d,c] * x[b,c,h,w] + bias[d].

    x: (B, C, H, W); weight: (D, C); bias2d: (D, 1)  ->  (B, D, H, W)
    """
    B, C, H, W = x.shape
    D = weight.shape[0]
    HW = H * W

    # Free (contiguous) reshape — no transpose, no extra HBM traffic.
    x3 = x.reshape(B, C, HW)

    x_isz = jnp.dtype(x.dtype).itemsize
    o_isz = jnp.dtype(x.dtype).itemsize
    w_isz = jnp.dtype(weight.dtype).itemsize

    t_d, n_d, t, n_hw = _choose_tiles(B, C, D, HW, x_isz, o_isz, w_isz, max_lane_tile)

    # Derive the VMEM limit from the actual double-buffered block sizes.
    blk_bytes = 2 * (t_d * t * o_isz      # out block
                     + C * t * x_isz      # x block
                     + t_d * C * w_isz    # weight block
                     + t_d * w_isz)       # bias block
    vmem_limit = int(min(max(blk_bytes + (4 << 20), 16 << 20), 48 << 20))

    # Grid: D innermost -> x block index constant across D tiles (x stays
    # resident; no redundant x DMA when D is tiled).
    grid = (B, n_hw, n_d)

    y3 = pl.pallas_call(
        _encoder_kernel,
        out_shape=jax.ShapeDtypeStruct((B, D, HW), x.dtype),
        grid_spec=pltpu.PrefetchScalarGridSpec(
            num_scalar_prefetch=0,
            grid=grid,
            in_specs=[
                pl.BlockSpec((1, C, t), lambda b, j, dj: (b, 0, j)),   # x tile
                pl.BlockSpec((t_d, C), lambda b, j, dj: (dj, 0)),      # weight tile
                pl.BlockSpec((t_d, 1), lambda b, j, dj: (dj, 0)),      # bias tile
            ],
            out_specs=pl.BlockSpec((1, t_d, t), lambda b, j, dj: (b, dj, j)),
        ),
        compiler_params=pltpu.CompilerParams(
            dimension_semantics=("parallel", "parallel", "parallel"),
            vmem_limit_bytes=vmem_limit,
        ),
    )(x3, weight, bias2d)

    return y3.reshape(B, D, H, W)


class DefaultEncoderPallas:
    """JAX/Pallas equivalent of the PyTorch DefaultEncoder."""

    def __init__(self, input_dim, d_model, key):
        self.equal_dim = (input_dim == d_model)
        if not self.equal_dim:
            kw, kb = jax.random.split(key)
            bound = 1.0 / (input_dim ** 0.5)
            # Native nn.Linear layout: weight (d_model, input_dim) — no .T per call.
            self.weight = jax.random.uniform(
                kw, (d_model, input_dim), jnp.float32, -bound, bound)
            # Pre-shaped (D, 1) bias — broadcasts over the lane (HW) axis.
            self.bias = jax.random.uniform(
                kb, (d_model, 1), jnp.float32, -bound, bound)

    def __call__(self, x):
        if self.equal_dim:
            return x
        return default_encoder_linear(x, self.weight, self.bias)


if __name__ == "__main__":
    key = jax.random.PRNGKey(0)
    k_x1, k_p1, k_x2, k_p2, k_x3, k_p3 = jax.random.split(key, 6)

    # --- Test 1: small-C VPU path, single D tile, B gives 2 parallel steps ---
    B, C, H, W = 2, 4, 16, 16          # input_dim = 4
    d_model = 32
    x = jax.random.normal(k_x1, (B, C, H, W), jnp.float32)
    enc = DefaultEncoderPallas(C, d_model, k_p1)
    y = jax.block_until_ready(enc(x))
    ref = jnp.einsum("dc,bchw->bdhw", enc.weight, x) \
        + enc.bias.reshape(1, d_model, 1, 1)
    assert y.shape == (B, d_model, H, W)
    assert jnp.allclose(y, ref, atol=1e-5, rtol=1e-5), \
        float(jnp.max(jnp.abs(y - ref)))

    # --- Test 2: MXU path (C > 4), tiled D with ragged edge (D = 600),
    #             ragged HW tiles (HW = 270, lane tile forced to 128) ---------
    B2, C2, H2, W2, D2 = 1, 16, 9, 30, 600
    x2 = jax.random.normal(k_x2, (B2, C2, H2, W2), jnp.float32)
    enc2 = DefaultEncoderPallas(C2, D2, k_p2)
    ref2 = jnp.einsum("dc,bchw->bdhw", enc2.weight, x2) \
        + enc2.bias.reshape(1, D2, 1, 1)
    y2 = jax.block_until_ready(
        default_encoder_linear(x2, enc2.weight, enc2.bias, max_lane_tile=128))
    # Loose tolerance: default-precision f32 matmul on TPU may use bf16 passes.
    assert jnp.allclose(y2, ref2, atol=5e-2, rtol=5e-2), \
        float(jnp.max(jnp.abs(y2 - ref2)))
    # Same shapes, default lane tile (single full-HW, non-128-aligned block).
    y2b = jax.block_until_ready(
        default_encoder_linear(x2, enc2.weight, enc2.bias))
    assert jnp.allclose(y2b, ref2, atol=5e-2, rtol=5e-2), \
        float(jnp.max(jnp.abs(y2b - ref2)))

    # --- Test 3: single-step grid gets split for v7x megacore (B=1) ----------
    B3, C3, H3, W3, D3 = 1, 4, 32, 32, 64
    x3 = jax.random.normal(k_x3, (B3, C3, H3, W3), jnp.float32)
    enc3 = DefaultEncoderPallas(C3, D3, k_p3)
    y3 = jax.block_until_ready(enc3(x3))
    ref3 = jnp.einsum("dc,bchw->bdhw", enc3.weight, x3) \
        + enc3.bias.reshape(1, D3, 1, 1)
    assert jnp.allclose(y3, ref3, atol=1e-5, rtol=1e-5), \
        float(jnp.max(jnp.abs(y3 - ref3)))

    # --- equal_dim == True path: identity passthrough -----------------------
    enc_eq = DefaultEncoderPallas(C, C, k_p1)
    y_eq = jax.block_until_ready(enc_eq(x))
    assert jnp.array_equal(y_eq, x)

    print("KERNEL_OK")
</pallas_src>

<mosaic_0001>
module attributes {stable_mosaic.version = 11 : i64} {
  func.func @_encoder_kernel(%arg0: i32, %arg1: i32, %arg2: i32, %arg3: memref<1x4x256xf32, #tpu.memory_space<vmem>>, %arg4: memref<32x4xf32, #tpu.memory_space<vmem>>, %arg5: memref<32x1xf32, #tpu.memory_space<vmem>>, %arg6: memref<1x32x256xf32, #tpu.memory_space<vmem>>) attributes {dimension_semantics = [#tpu.dimension_semantics<parallel>, #tpu.dimension_semantics<parallel>, #tpu.dimension_semantics<parallel>], iteration_bounds = array<i64: 2, 1, 1>, scalar_prefetch = 0 : i64, scratch_operands = 0 : i64, tpu.core_type = #tpu.core_type<tc>, window_params = [{transform_indices = @transform_0, window_bounds = array<i64: 1, 4, 256>}, {transform_indices = @transform_1, window_bounds = array<i64: 32, 4>}, {transform_indices = @transform_2, window_bounds = array<i64: 32, 1>}, {transform_indices = @transform_3, window_bounds = array<i64: 1, 32, 256>}]} {
    %c0 = arith.constant 0 : index
    %c0_0 = arith.constant 0 : index
    %c0_1 = arith.constant 0 : index
    %0 = vector.load %arg3[%c0, %c0_0, %c0_1] : memref<1x4x256xf32, #tpu.memory_space<vmem>>, vector<1x4x256xf32>
    %1 = vector.shape_cast %0 : vector<1x4x256xf32> to vector<4x256xf32>
    %c0_2 = arith.constant 0 : index
    %c0_3 = arith.constant 0 : index
    %2 = vector.load %arg4[%c0_2, %c0_3] : memref<32x4xf32, #tpu.memory_space<vmem>>, vector<32x4xf32>
    %c0_4 = arith.constant 0 : index
    %c0_5 = arith.constant 0 : index
    %3 = vector.load %arg5[%c0_4, %c0_5] : memref<32x1xf32, #tpu.memory_space<vmem>>, vector<32x1xf32>
    %4 = vector.extract_strided_slice %2 {offsets = [0, 0], sizes = [32, 1], strides = [1, 1]} : vector<32x4xf32> to vector<32x1xf32>
    %5 = vector.extract_strided_slice %1 {offsets = [0, 0], sizes = [1, 256], strides = [1, 1]} : vector<4x256xf32> to vector<1x256xf32>
    %6 = vector.broadcast %4 : vector<32x1xf32> to vector<32x256xf32>
    %7 = vector.broadcast %5 : vector<1x256xf32> to vector<32x256xf32>
    %8 = arith.mulf %6, %7 : vector<32x256xf32>
    %9 = vector.extract_strided_slice %2 {offsets = [0, 1], sizes = [32, 1], strides = [1, 1]} : vector<32x4xf32> to vector<32x1xf32>
    %10 = vector.extract_strided_slice %1 {offsets = [1, 0], sizes = [1, 256], strides = [1, 1]} : vector<4x256xf32> to vector<1x256xf32>
    %11 = vector.broadcast %9 : vector<32x1xf32> to vector<32x256xf32>
    %12 = vector.broadcast %10 : vector<1x256xf32> to vector<32x256xf32>
    %13 = arith.mulf %11, %12 : vector<32x256xf32>
    %14 = arith.addf %8, %13 : vector<32x256xf32>
    %15 = vector.extract_strided_slice %2 {offsets = [0, 2], sizes = [32, 1], strides = [1, 1]} : vector<32x4xf32> to vector<32x1xf32>
    %16 = vector.extract_strided_slice %1 {offsets = [2, 0], sizes = [1, 256], strides = [1, 1]} : vector<4x256xf32> to vector<1x256xf32>
    %17 = vector.broadcast %15 : vector<32x1xf32> to vector<32x256xf32>
    %18 = vector.broadcast %16 : vector<1x256xf32> to vector<32x256xf32>
    %19 = arith.mulf %17, %18 : vector<32x256xf32>
    %20 = arith.addf %14, %19 : vector<32x256xf32>
    %21 = vector.extract_strided_slice %2 {offsets = [0, 3], sizes = [32, 1], strides = [1, 1]} : vector<32x4xf32> to vector<32x1xf32>
    %22 = vector.extract_strided_slice %1 {offsets = [3, 0], sizes = [1, 256], strides = [1, 1]} : vector<4x256xf32> to vector<1x256xf32>
    %23 = vector.broadcast %21 : vector<32x1xf32> to vector<32x256xf32>
    %24 = vector.broadcast %22 : vector<1x256xf32> to vector<32x256xf32>
    %25 = arith.mulf %23, %24 : vector<32x256xf32>
    %26 = arith.addf %20, %25 : vector<32x256xf32>
    %27 = vector.broadcast %3 : vector<32x1xf32> to vector<32x256xf32>
    %28 = arith.addf %26, %27 : vector<32x256xf32>
    %c0_6 = arith.constant 0 : index
    %c0_7 = arith.constant 0 : index
    %c0_8 = arith.constant 0 : index
    %29 = vector.load %arg6[%c0_6, %c0_7, %c0_8] : memref<1x32x256xf32, #tpu.memory_space<vmem>>, vector<1x32x256xf32>
    %30 = vector.shape_cast %29 : vector<1x32x256xf32> to vector<32x256xf32>
    %31 = vector.shape_cast %28 : vector<32x256xf32> to vector<1x32x256xf32>
    tpu.vector_store %arg6[%c0_6, %c0_7, %c0_8], %31 {strides = array<i32>} : memref<1x32x256xf32, #tpu.memory_space<vmem>>, vector<1x32x256xf32>,
    return
  }
  func.func @transform_0(%arg0: i32, %arg1: i32, %arg2: i32) -> (i32, i32, i32) {
    %c0_i32 = arith.constant 0 : i32
    %c0_i32_0 = arith.constant 0 : i32
    return %arg0, %c0_i32, %arg1 : i32, i32, i32
  }
  func.func @transform_1(%arg0: i32, %arg1: i32, %arg2: i32) -> (i32, i32) {
    %c0_i32 = arith.constant 0 : i32
    %c0_i32_0 = arith.constant 0 : i32
    return %arg2, %c0_i32 : i32, i32
  }
  func.func @transform_2(%arg0: i32, %arg1: i32, %arg2: i32) -> (i32, i32) {
    %c0_i32 = arith.constant 0 : i32
    %c0_i32_0 = arith.constant 0 : i32
    return %arg2, %c0_i32 : i32, i32
  }
  func.func @transform_3(%arg0: i32, %arg1: i32, %arg2: i32) -> (i32, i32, i32) {
    %c0_i32 = arith.constant 0 : i32
    return %arg0, %arg2, %arg1 : i32, i32, i32
  }
}

</mosaic_0001>

<bundles_post_ra>
// kernel: tpu_custom_call.1
= control target key start
LH: loop header
LB: loop body
LE: loop exit
PB: predicated region body
PF: predicated region fallthrough
CT: control target
= control target key end

     0   :  { %8 = vsyncpa [#allocation3], 0  ;;  %s990_s0 = inlined_call_operand.vmem [shape: f32[2,4,256], index: 0, kind: input, shape index: {}]   ;;  %s991_s1 = inlined_call_operand.vmem [shape: f32[32,4], index: 1, kind: input, shape index: {}]   ;;  %s992_s2 = inlined_call_operand.vmem [shape: f32[32,1], index: 2, kind: input, shape index: {}]   ;;  %s993_s3 = inlined_call_operand.hbm [shape: f32[2,32,256], index: 3, kind: output, shape index: {}]  }
   0x1   :  { %10 = vsyncpa [#allocation3 + $0x1], 0  ;;  %s824_s12 = smov 0   ;;  %s826_s13 = smov 0  }
   0x2   :  { %s828_s14 = smov 0   ;;  %s830_s15 = smov 0  }
   0x3   :  { %s832_s16 = smov 0   ;;  %s834_s17 = smov 0  }
   0x4 LB: > { %s629_s18 = sadd.s32 4294967295, %s795_s17   ;;  %s630_s19 = sadd.s32 4294967294, %s795_s17   ;;  %s795_s17 = sphi %s834_s17, %s16_s17   ;;  %s791_s16 = sphi %s832_s16, %s1000_s16   ;;  %s787_s15 = sphi %s830_s15, %s999_s15   ;;  %s783_s14 = sphi %s828_s14, %s998_s14   ;;  %s779_s13 = sphi %s826_s13, %s997_s13   ;;  %s775_s12 = sphi %s824_s12, %s996_s12  }
   0x5   : > { %s35_s20 = sadd.s32 1, %s791_s16  ;;  %s126_s21 = sadd.s32 1, %s783_s14 }
   0x6   : > { %p37_p0 = scmp.ge.s32.totalorder %s35_s20, 2  ;;  %p136_p1 = scmp.ne.s32.totalorder %s783_s14, %s779_s13 }
   0x7   : > { %p137_p2 = scmp.eq.s32.totalorder %s629_s18, 1  ;;  %p142_p3 = scmp.ne.s32.totalorder %s779_s13, %s775_s12 }
   0x8   : > { %s1002_s20 = smov (%p37_p0, %s35_s20), 0  ;;  %p143_p5 = scmp.eq.s32.totalorder %s630_s19, 1 }
   0x9   : > { %p864_p4 = por %p137_p2, %p136_p1  ;;  %s119_s23 = ssub.s32 %s791_s16, %s1002_s20 }
   0xa   : > { %p635_p6 = scmp.ge.s32.totalorder %s795_s17, 1  ;;  %p124_p7 = scmp.eq.s32.totalorder %s119_s23, 0 }
   0xb   : > { %p871_p8 = por %p143_p5, %p142_p3  ;;  %p192_p9 = scmp.lt.s32.totalorder %s795_s17, 3 }
   0xc   : > { %s877_s25 = scalar_select %p124_p7, %s783_s14, %s126_s21  }
   0xd   : > { %p193_p10 = pnand %p635_p6, %p192_p9 }
   0xe   : > { %v257_v0 = vld [vmem:[%s991_s1 + $0x10] sm:$0xff] (!%p193_p10)  ;;  %v255_v1 = vld [vmem:[%s991_s1] sm:$0xff] (!%p193_p10)  ;;  %v797_v2 = vmov (!%p193_p10), 0   ;;  %v258_v3 = vld [vmem:[%s991_s1 + $0x18] sm:$0xff] (!%p193_p10)  ;;  %v798_v5 = vmov (!%p193_p10), 1   ;;  %v799_v6 = vmov (!%p193_p10), 2   ;;  %v284_v16 = vlaneseq (!%p193_p10) }
   0xf   : > { %196 = sbr.rel (%p193_p10) target bundleno = 209 (0xd1), region = 32  ;;  %708 = vset.pattern.permute.xlu1 (!%p193_p10), %v797_v2  ;;  %707 = vset.pattern.permute.xlu0 (!%p193_p10), %v797_v2  ;;  %v256_v4 = vld [vmem:[%s991_s1 + $0x8] sm:$0xff] (!%p193_p10)  ;;  %v800_v7 = vmov (!%p193_p10), 3   ;;  %v259_v9 = vld [vmem:[%s992_s2] sm:$0xff] (!%p193_p10)  ;;  %v261_v10 = vld [vmem:[%s992_s2 + $0x10] sm:$0xff] (!%p193_p10)  ;;  %p231_p11 = scmp.lt.s32.totalorder (!%p193_p10), %s787_s15, 1 }
  0x10   : > { %275 = vperm.xlu1 (!%p193_p10), %708, %v257_v0   ;;  %265 = vperm.xlu0 (!%p193_p10), %707, %v255_v1   ;;  %v260_v8 = vld [vmem:[%s992_s2 + $0x8] sm:$0xff] (!%p193_p10)  ;;  %v262_v11 = vld [vmem:[%s992_s2 + $0x18] sm:$0xff] (!%p193_p10)  ;;  %v285_v19 = vshrl.u32 (!%p193_p10), %v284_v16, 7  ;;  %s227_s30 = sand.u32 (!%p193_p10), 1, %s779_s13   ;;  %s645_s6 = sshll.u32 (!%p193_p10), %s787_s15, 10 }
  0x11   : > { %s636_s4 = sshll.u32 (!%p193_p10), %s227_s30, 6  ;;  %s936_s10 = scalar_lea.hbm (!%p193_p10), %s993_s3, %s645_s6 }
  0x12   : > { %v328_v22 = vsub.s32 (!%p193_p10), 1, %v285_v19  ;;  %v332_v23 = vsub.s32 (!%p193_p10), 5, %v285_v19  ;;  %v286_v24 = vsub.s32 (!%p193_p10), 0, %v285_v19  ;;  %v290_v25 = vsub.s32 (!%p193_p10), 4, %v285_v19  ;;  %s923_s5 = scalar_lea.vmem (!%p193_p10), [#allocation2], %s636_s4  ;;  %s801_s18 = smov (!%p193_p10), [#allocation2]  }
  0x13   : > { %v378_v26 = vsub.s32 (!%p193_p10), 2, %v285_v19  ;;  %v382_v27 = vsub.s32 (!%p193_p10), 6, %v285_v19  ;;  %v428_v37 = vsub.s32 (!%p193_p10), 3, %v285_v19  ;;  %v432_v38 = vsub.s32 (!%p193_p10), 7, %v285_v19  ;;  %s515_s7 = sshll.u32 (!%p193_p10), %s923_s5, 4  ;;  %s721_s19 = sshll.u32 (!%p193_p10), %s801_s18, 4  ;;  %s938_s7 = int_to_ptr.vmem [resolvable:$true] %s515_s7  ;;  %s722_s19 = int_to_ptr.vmem [resolvable:$false] %s721_s19 }
  0x14   : > { %280 = vperm.xlu1 (!%p193_p10), %708, %v258_v3   ;;  %270 = vperm.xlu0 (!%p193_p10), %707, %v256_v4   ;;  %s717_s11 = scalar_lea.vmem (!%p193_p10), %s938_s7, 1024  ;;  %s723_s21 = scalar_lea.vmem (!%p193_p10), %s722_s19, 2048 }
  0x15   : > { %p718_p12 = scmp.ne.s32.totalorder (!%p193_p10), %s938_s7, %s717_s11  ;;  %p724_p1 = scmp.lt.s32.totalorder (!%p193_p10), %s938_s7, %s722_s19 }
  0x16   : > { %s232_s23 = scalar_select %p231_p11, %s787_s15, 1 }
  0x17   : > { %s944_s15 = scalar_lea.sflag [#allocation3], %s227_s30  ;;  %p719_p13 = pnand %p718_p12, %p864_p4 }
  0x18   : > { %710 = vset.pattern.permute.xlu1 %v798_v5  ;;  %709 = vset.pattern.permute.xlu0 %v798_v5  ;;  %s644_s26 = sshll.u32 %s232_s23, 3  ;;  %p725_p2 = scmp.lt.s32.totalorder %s723_s21, %s717_s11 }
  0x19   : > { %315 = vperm.xlu1 %710, %v256_v4   ;;  %311 = vperm.xlu0 %709, %v255_v1   ;;  %s238_s29 = scalar_lea.vmem %s990_s0, %s644_s26  ;;  %p720_p0 = pneg %p719_p13 }
  0x1a   : > { %v254_v28 = vld [vmem:[%s238_s29] sm:$0xff]  ;;  %p726_p3 = por %p725_p2, %p724_p1 }
  0x1b   : > { %v329_v29 = vrot.slane %v254_v28, %v328_v22  ;;  %v333_v30 = vrot.slane %v254_v28, %v332_v23  ;;  %v287_v33 = vrot.slane %v254_v28, %v286_v24  ;;  %v291_v34 = vrot.slane %v254_v28, %v290_v25 }
  0x1c   : > { %v379_v35 = vrot.slane %v254_v28, %v378_v26  ;;  %v383_v36 = vrot.slane %v254_v28, %v382_v27  ;;  %v429_v47 = vrot.slane %v254_v28, %v428_v37  ;;  %v433_v48 = vrot.slane %v254_v28, %v432_v38  ;;  %p727_p5 = pnand %p726_p3, %p720_p0 }
  0x1d   : > { %319 = vperm.xlu1 %710, %v257_v0   ;;  %323 = vperm.xlu0 %709, %v258_v3   ;;  %v339_v39 = vrot.slane %v329_v29, %v328_v22  ;;  %v343_v40 = vrot.slane %v333_v30, %v328_v22  ;;  %v297_v43 = vrot.slane %v287_v33, %v286_v24 }
  0x1e   : > { %v301_v44 = vrot.slane %v291_v34, %v286_v24  ;;  %v389_v45 = vrot.slane %v379_v35, %v378_v26  ;;  %v393_v46 = vrot.slane %v383_v36, %v378_v26  ;;  %v439_v63 = vrot.slane %v429_v47, %v428_v37 }
  0x21   : > { %711 = vset.pattern.permute.xlu1 %v799_v6  ;;  %712 = vset.pattern.permute.xlu0 %v799_v6 }
  0x22   : > { %361 = vperm.xlu1 %711, %v255_v1   ;;  %365 = vperm.xlu0 %712, %v256_v4  }
  0x26   : > { %369 = vperm.xlu1 %711, %v257_v0   ;;  %713 = vset.pattern.permute.xlu0 %v800_v7 }
  0x27   : > { %411 = vperm.xlu0 %713, %v255_v1  }
  0x2a   : > { %373 = vperm.xlu1 %711, %v258_v3  }
  0x2b   : > { %423 = vperm.xlu0 %713, %v258_v3  }
  0x2e   : > { %714 = vset.pattern.permute.xlu1 %v800_v7 }
  0x2f   : > { %415 = vperm.xlu1 %714, %v256_v4   ;;  %716 = vset.pattern.permute.xlu0 %v797_v2 }
  0x30   : > { %467 = vperm.xlu0 %716, %v260_v8  }
  0x33   : > { %419 = vperm.xlu1 %714, %v257_v0   ;;  %v443_v0 = vrot.slane %v433_v48, %v428_v37 }
  0x37   : > { %715 = vset.pattern.permute.xlu1 %v797_v2 }
  0x38   : > { %462 = vperm.xlu1 %715, %v259_v9  }
  0x3c   : > { %472 = vperm.xlu1 %715, %v261_v10  }
  0x40   : > { %477 = vperm.xlu1 %715, %v262_v11  }
  0x8f   : > { %v903_v12 = vpop.permute.xlu1 %275  ;;  %v266_v13 = vpop.permute.xlu0 %265 }
  0x90   : > { %v302_v54 = vmul.f32 %v297_v43, %v266_v13  ;;  %v303_v55 = vmul.f32 %v301_v44, %v266_v13  ;;  %v306_v19 = vmul.f32 %v297_v43, %v903_v12  ;;  %v307_v22 = vmul.f32 %v301_v44, %v903_v12 }
  0x93   : > { %v906_v14 = vpop.permute.xlu1 %280  ;;  %v271_v15 = vpop.permute.xlu0 %270 }
  0x94   : > { %v304_v49 = vmul.f32 %v297_v43, %v271_v15  ;;  %v305_v50 = vmul.f32 %v301_v44, %v271_v15  ;;  %v309_v30 = vmul.f32 %v301_v44, %v906_v14 }
  0x98   : > { %v316_v17 = vpop.permute.xlu1 %315  ;;  %v312_v18 = vpop.permute.xlu0 %311 }
  0x99   : > { %v346_v51 = vmul.f32 %v339_v39, %v316_v17  ;;  %v347_v52 = vmul.f32 %v343_v40, %v316_v17  ;;  %v344_v56 = vmul.f32 %v339_v39, %v312_v18  ;;  %v345_v57 = vmul.f32 %v343_v40, %v312_v18 }
  0x9b   : > { %v354_v61 = vadd.f32 %v346_v51, %v304_v49  ;;  %v355_v62 = vadd.f32 %v347_v52, %v305_v50  ;;  %v352_v1 = vadd.f32 %v344_v56, %v302_v54  ;;  %v353_v2 = vadd.f32 %v345_v57, %v303_v55 }
  0x9c   : > { %v320_v20 = vpop.permute.xlu1 %319  ;;  %v909_v21 = vpop.permute.xlu0 %323 }
  0x9d   : > { %v348_v10 = vmul.f32 %v339_v39, %v320_v20  ;;  %v349_v11 = vmul.f32 %v343_v40, %v320_v20  ;;  %v350_v23 = vmul.f32 %v339_v39, %v909_v21  ;;  %v351_v24 = vmul.f32 %v343_v40, %v909_v21 }
  0x9e   : > { %v308_v20 = vmul.f32 %v297_v43, %v906_v14 }
  0x9f   : > { %v356_v33 = vadd.f32 %v348_v10, %v306_v19  ;;  %v357_v34 = vadd.f32 %v349_v11, %v307_v22  ;;  %v359_v14 = vadd.f32 %v351_v24, %v309_v30 }
  0xa0   : > { %v358_v39 = vadd.f32 %v350_v23, %v308_v20 }
  0xa1   : > { %v362_v31 = vpop.permute.xlu1 %361  ;;  %v366_v32 = vpop.permute.xlu0 %365 }
  0xa2   : > { %v396_v58 = vmul.f32 %v389_v45, %v366_v32  ;;  %v397_v59 = vmul.f32 %v393_v46, %v366_v32  ;;  %v394_v3 = vmul.f32 %v389_v45, %v362_v31  ;;  %v395_v4 = vmul.f32 %v393_v46, %v362_v31 }
  0xa4   : > { %v404_v6 = vadd.f32 %v396_v58, %v354_v61  ;;  %v405_v7 = vadd.f32 %v397_v59, %v355_v62  ;;  %v402_v26 = vadd.f32 %v394_v3, %v352_v1  ;;  %v403_v27 = vadd.f32 %v395_v4, %v353_v2 }
  0xa5   : > { %v370_v41 = vpop.permute.xlu1 %369 }
  0xa6   : > { %v412_v42 = vpop.permute.xlu0 %411  ;;  %v398_v31 = vmul.f32 %v389_v45, %v370_v41  ;;  %v399_v32 = vmul.f32 %v393_v46, %v370_v41 }
  0xa7   : > { %v444_v15 = vmul.f32 %v439_v63, %v412_v42  ;;  %v445_v16 = vmul.f32 %v443_v0, %v412_v42 }
  0xa8   : > { %v406_v41 = vadd.f32 %v398_v31, %v356_v33  ;;  %v407_v42 = vadd.f32 %v399_v32, %v357_v34 }
  0xa9   : > { %v374_v53 = vpop.permute.xlu1 %373  ;;  %v452_v12 = vadd.f32 %v444_v15, %v402_v26  ;;  %v453_v21 = vadd.f32 %v445_v16, %v403_v27 }
  0xaa   : > { %v424_v60 = vpop.permute.xlu0 %423  ;;  %v400_v35 = vmul.f32 %v389_v45, %v374_v53  ;;  %v401_v36 = vmul.f32 %v393_v46, %v374_v53 }
  0xab   : > { %v450_v47 = vmul.f32 %v439_v63, %v424_v60  ;;  %v451_v48 = vmul.f32 %v443_v0, %v424_v60 }
  0xac   : > { %v408_v49 = vadd.f32 %v400_v35, %v358_v39  ;;  %v409_v50 = vadd.f32 %v401_v36, %v359_v14 }
  0xae   : > { %v416_v5 = vpop.permute.xlu1 %415  ;;  %v458_v54 = vadd.f32 %v450_v47, %v408_v49  ;;  %v459_v55 = vadd.f32 %v451_v48, %v409_v50 }
  0xaf   : > { %v446_v8 = vmul.f32 %v439_v63, %v416_v5  ;;  %v447_v9 = vmul.f32 %v443_v0, %v416_v5  ;;  %v468_v13 = vpop.permute.xlu0 %467 }
  0xb1   : > { %v454_v17 = vadd.f32 %v446_v8, %v404_v6  ;;  %v455_v18 = vadd.f32 %v447_v9, %v405_v7 }
  0xb2   : > { %v420_v25 = vpop.permute.xlu1 %419 }
  0xb3   : > { %v482_v28 = vadd.f32 %v468_v13, %v454_v17  ;;  %v483_v29 = vadd.f32 %v468_v13, %v455_v18  ;;  %v448_v37 = vmul.f32 %v439_v63, %v420_v25  ;;  %v449_v38 = vmul.f32 %v443_v0, %v420_v25 }
  0xb5   : > { %490 = vst [vmem:[%s923_s5 + $0x10] sm:$0xff] %v482_v28  ;;  %491 = vst [vmem:[%s923_s5 + $0x18] sm:$0xff] %v483_v29  ;;  %v456_v45 = vadd.f32 %v448_v37, %v406_v41  ;;  %v457_v46 = vadd.f32 %v449_v38, %v407_v42 }
  0xb7   : > { %v463_v40 = vpop.permute.xlu1 %462 }
  0xb8   : > { %v480_v43 = vadd.f32 %v463_v40, %v452_v12  ;;  %v481_v44 = vadd.f32 %v463_v40, %v453_v21 }
  0xba   : > { %488 = vst [vmem:[%s923_s5] sm:$0xff] %v480_v43  ;;  %489 = vst [vmem:[%s923_s5 + $0x8] sm:$0xff] %v481_v44 }
  0xbb   : > { %v473_v51 = vpop.permute.xlu1 %472 }
  0xbc   : > { %v484_v52 = vadd.f32 %v473_v51, %v456_v45  ;;  %v485_v53 = vadd.f32 %v473_v51, %v457_v46 }
  0xbe   : > { %492 = vst [vmem:[%s923_s5 + $0x20] sm:$0xff] %v484_v52  ;;  %493 = vst [vmem:[%s923_s5 + $0x28] sm:$0xff] %v485_v53 }
  0xbf   : > { %v478_v56 = vpop.permute.xlu1 %477 }
  0xc0   : > { %v486_v57 = vadd.f32 %v478_v56, %v458_v54  ;;  %v487_v58 = vadd.f32 %v478_v56, %v459_v55 }
  0xc2   : > { %494 = vst [vmem:[%s923_s5 + $0x30] sm:$0xff] %v486_v57  ;;  %495 = vst [vmem:[%s923_s5 + $0x38] sm:$0xff] %v487_v58 }
  0xc3   : > { %730 = shalt.err (!%p727_p5)
}
  0xc4   : > { %s731_s23 = scalar_lea.hbm %s936_s10, 1024  ;;  %s735_s28 = scalar_lea.hbm %s993_s3, 2048 }
  0xc5   : > { %p732_p6 = scmp.ne.s32.totalorder %s936_s10, %s731_s23  ;;  %p736_p10 = scmp.lt.u32.totalorder %s936_s10, %s993_s3 }
  0xc6   : > { %p737_p11 = scmp.lt.u32.totalorder %s735_s28, %s731_s23  ;;  %p739_p13 = scmp.lt.u32.totalorder %s731_s23, %s936_s10 }
  0xc7   : > { %p733_p7 = pnand %p732_p6, %p864_p4 }
  0xc8   : > { %p738_p12 = por %p737_p11, %p736_p10 }
  0xc9   : > { %p734_p9 = pneg %p733_p7 }
  0xca   : > { %p740_p0 = por %p739_p13, %p738_p12 }
  0xcc   : > { %p741_p1 = pnand %p740_p0, %p734_p9 }
  0xce   : > { %744 = shalt.err (!%p741_p1)
}
  0xcf   : > { %s802_s4 = smov 256   ;;  %s803_s5 = smov 16  }
  0xd0   : > { %646 = dma.vmem_to_hbm [thread:$0]  (%p864_p4), %s938_s7, 1024, %s936_s10, %s944_s15, %s802_s4, %s802_s4, %s803_s5  }
  0xd1 PF: > { %p652_p2 = scmp.ge.s32.totalorder %s795_s17, 2  ;;  %s530_s6 = sand.u32 1, %s775_s12  }
  0xd2   : > { %s531_s8 = scalar_lea.sflag [#allocation3], %s530_s6 }
  0xd3   : > { %p649_p3 = pnand %p652_p2, %p871_p8 }
  0xd5   : > { %770 = dma.done.wait (!%p649_p3), %s531_s8, 1024  }
  0xd6   : > { %772 = vsyncadd (!%p649_p3), %s531_s8, 4294966272  ;;  %s16_s17 = sadd.s32 1, %s795_s17   ;;  %s996_s12 = smov %s779_s13 }
  0xd7   : > { %p13_p5 = scmp.ge.s32.totalorder %s16_s17, 4   ;;  %s997_s13 = smov %s783_s14 }
  0xd8   : > { %s998_s14 = smov %s877_s25  ;;  %s999_s15 = smov %s791_s16 }
  0xd9   : > { %s1000_s16 = smov %s1002_s20  ;;  %15 = sbr.rel (!%p13_p5) target bundleno = 4 (0x4), region = 73 }
  0xe0   :  { %536 = vsyncpa [#allocation3], 1 }
  0xe1   :  { %538 = vsyncpa [#allocation3 + $0x1], 1 }

</bundles_post_ra>
